<compile_context>
chip_gen: v7x
topology: tpu7x:2x2x1
jax: 0.10.0
libtpu: 0.0.40
codegen_flags: <defaults>
</compile_context>

<pallas_src>
import jax
import jax.numpy as jnp
from jax.experimental import pallas as pl
from jax.experimental.pallas import tpu as pltpu


def link_predictor_kernel(u_ref, r_ref, w1u_ref, w1r_ref, b1_ref,
                          w2_ref, b2_ref, o_ref):
    # hidden layer: [TN, H] = relu(u @ W1u + r @ W1r + b1), f32 accumulation
    h = (jnp.dot(u_ref[...], w1u_ref[...], preferred_element_type=jnp.float32)
         + jnp.dot(r_ref[...], w1r_ref[...], preferred_element_type=jnp.float32)
         + b1_ref[...])
    h = jnp.maximum(h, 0.0)
    # second layer, lane-dense: (1, H) contracted with (TN, H) over H -> (1, TN)
    logit = jax.lax.dot_general(
        w2_ref[...], h,
        dimension_numbers=(((1,), (1,)), ((), ())),
        preferred_element_type=jnp.float32) + b2_ref[...]
    o_ref[...] = jax.nn.sigmoid(logit).astype(o_ref.dtype)


def link_predictor(user_emb, restaurant_emb, w1, b1, w2, b2, *, tile_n=512):
    """user_emb, restaurant_emb: [N, H]; w1: [2H, H]; b1: [H]; w2: [H, 1]; b2: [1]."""
    n, hid = user_emb.shape
    assert w1.shape == (2 * hid, hid)
    assert restaurant_emb.shape == (n, hid)

    # Tile size: multiple of 128, no larger than the (128-rounded) batch.
    n_round128 = ((n + 127) // 128) * 128
    tile_n = max(128, min(((tile_n + 127) // 128) * 128, n_round128))

    # Split W1 so the concat never materializes; bf16 inputs, f32 accumulation.
    w1u = w1[:hid].astype(jnp.bfloat16)               # [H, H]
    w1r = w1[hid:].astype(jnp.bfloat16)               # [H, H]
    u = user_emb.astype(jnp.bfloat16)
    r = restaurant_emb.astype(jnp.bfloat16)
    b1_2d = b1.reshape(1, hid).astype(jnp.float32)    # broadcast over batch rows
    w2_row = w2.reshape(1, hid).astype(jnp.float32)   # (1,H) contracted over H
    b2_2d = b2.reshape(1, 1).astype(jnp.float32)

    # Pad batch up to a multiple of the tile size (padded rows sliced off below).
    num_tiles = pl.cdiv(n, tile_n)
    n_pad = num_tiles * tile_n
    if n_pad != n:
        pad = n_pad - n
        u = jnp.pad(u, ((0, pad), (0, 0)))
        r = jnp.pad(r, ((0, pad), (0, 0)))

    emb_spec = pl.BlockSpec((tile_n, hid), lambda i: (i, 0))
    w_spec = pl.BlockSpec((hid, hid), lambda i: (0, 0))    # VMEM-resident
    b1_spec = pl.BlockSpec((1, hid), lambda i: (0, 0))
    w2_spec = pl.BlockSpec((1, hid), lambda i: (0, 0))
    b2_spec = pl.BlockSpec((1, 1), lambda i: (0, 0))
    out_spec = pl.BlockSpec((1, tile_n), lambda i: (0, i))  # lane-dense row

    bytes_in = (2 * n_pad * hid * 2          # bf16 embeddings
                + 2 * hid * hid * 2          # bf16 W1 halves
                + (hid + hid + 1 + 1) * 4)   # f32 b1, w2, b2
    out = pl.pallas_call(
        link_predictor_kernel,
        out_shape=jax.ShapeDtypeStruct((1, n_pad), jnp.float32),
        grid=(num_tiles,),
        in_specs=[emb_spec, emb_spec, w_spec, w_spec, b1_spec, w2_spec, b2_spec],
        out_specs=out_spec,
        compiler_params=pltpu.CompilerParams(
            dimension_semantics=("parallel",)),
        cost_estimate=pl.CostEstimate(
            flops=4 * n_pad * hid * hid + 2 * n_pad * hid,
            transcendentals=n_pad,
            bytes_accessed=bytes_in + n_pad * 4),
    )(u, r, w1u, w1r, b1_2d, w2_row, b2_2d)

    # (1, N_pad) lane-dense slab -> (N, 1)
    return out.reshape(n_pad, 1)[:n]


def _init_params(key, hidden_channels):
    """Deterministic init mimicking torch.nn.Linear default (uniform ±1/sqrt(fan_in))."""
    k1, k2, k3, k4 = jax.random.split(key, 4)
    fan1 = 2 * hidden_channels
    lim1 = 1.0 / jnp.sqrt(fan1)
    w1 = jax.random.uniform(k1, (fan1, hidden_channels), jnp.float32, -lim1, lim1)
    b1 = jax.random.uniform(k2, (hidden_channels,), jnp.float32, -lim1, lim1)
    fan2 = hidden_channels
    lim2 = 1.0 / jnp.sqrt(fan2)
    w2 = jax.random.uniform(k3, (fan2, 1), jnp.float32, -lim2, lim2)
    b2 = jax.random.uniform(k4, (1,), jnp.float32, -lim2, lim2)
    return w1, b1, w2, b2


def _reference(user_emb, restaurant_emb, w1, b1, w2, b2):
    x = jnp.concatenate([user_emb, restaurant_emb], axis=-1)
    h = jnp.maximum(x @ w1 + b1, 0.0)
    return jax.nn.sigmoid(h @ w2 + b2)


if __name__ == "__main__":
    hidden = 32
    batch = 8
    key = jax.random.PRNGKey(0)
    ku, kr, kp = jax.random.split(key, 3)

    user_emb = jax.random.normal(ku, (batch, hidden), jnp.float32)
    restaurant_emb = jax.random.normal(kr, (batch, hidden), jnp.float32)
    w1, b1, w2, b2 = _init_params(kp, hidden)

    out = link_predictor(user_emb, restaurant_emb, w1, b1, w2, b2)
    out = jax.block_until_ready(out)
    assert out.shape == (batch, 1)

    # Reference on bf16-rounded inputs (kernel casts embeddings/W1 to bf16).
    u_bf = user_emb.astype(jnp.bfloat16).astype(jnp.float32)
    r_bf = restaurant_emb.astype(jnp.bfloat16).astype(jnp.float32)
    w1_bf = w1.astype(jnp.bfloat16).astype(jnp.float32)
    ref = _reference(u_bf, r_bf, w1_bf, b1, w2, b2)
    assert jnp.allclose(out, ref, atol=5e-4, rtol=5e-4), (
        f"max abs err {jnp.max(jnp.abs(out - ref))}")
    print("KERNEL_OK")
</pallas_src>

<mosaic_0001>
module attributes {stable_mosaic.version = 11 : i64} {
  func.func @link_predictor_kernel(%arg0: i32, %arg1: memref<128x32xbf16, #tpu.memory_space<vmem>>, %arg2: memref<128x32xbf16, #tpu.memory_space<vmem>>, %arg3: memref<32x32xbf16, #tpu.memory_space<vmem>>, %arg4: memref<32x32xbf16, #tpu.memory_space<vmem>>, %arg5: memref<1x32xf32, #tpu.memory_space<vmem>>, %arg6: memref<1x32xf32, #tpu.memory_space<vmem>>, %arg7: memref<1x1xf32, #tpu.memory_space<vmem>>, %arg8: memref<1x128xf32, #tpu.memory_space<vmem>>) attributes {dimension_semantics = [#tpu.dimension_semantics<parallel>], iteration_bounds = array<i64: 1>, scalar_prefetch = 0 : i64, scratch_operands = 0 : i64, tpu.core_type = #tpu.core_type<tc>, window_params = [{transform_indices = @transform_0, window_bounds = array<i64: 128, 32>}, {transform_indices = @transform_1, window_bounds = array<i64: 128, 32>}, {pipeline_mode = #tpu.pipeline_mode<synchronous>, transform_indices = @transform_2, window_bounds = array<i64: 32, 32>}, {pipeline_mode = #tpu.pipeline_mode<synchronous>, transform_indices = @transform_3, window_bounds = array<i64: 32, 32>}, {pipeline_mode = #tpu.pipeline_mode<synchronous>, transform_indices = @transform_4, window_bounds = array<i64: 1, 32>}, {pipeline_mode = #tpu.pipeline_mode<synchronous>, transform_indices = @transform_5, window_bounds = array<i64: 1, 32>}, {pipeline_mode = #tpu.pipeline_mode<synchronous>, transform_indices = @transform_6, window_bounds = array<i64: 1, 1>}, {transform_indices = @transform_7, window_bounds = array<i64: 1, 128>}]} {
    %c0 = arith.constant 0 : index
    %c0_0 = arith.constant 0 : index
    %0 = vector.load %arg1[%c0, %c0_0] : memref<128x32xbf16, #tpu.memory_space<vmem>>, vector<128x32xbf16>
    %c0_1 = arith.constant 0 : index
    %c0_2 = arith.constant 0 : index
    %1 = vector.load %arg3[%c0_1, %c0_2] : memref<32x32xbf16, #tpu.memory_space<vmem>>, vector<32x32xbf16>
    %cst = arith.constant dense<0.000000e+00> : vector<128x32xf32>
    %2 = tpu.matmul %0, %1, %cst {dimension_numbers = #tpu.dot_dimension_numbers<[1], [0], [0], [1], [0, 0, 1, 1], [], []>} : vector<128x32xbf16>, vector<32x32xbf16>, vector<128x32xf32> -> vector<128x32xf32>
    %c0_3 = arith.constant 0 : index
    %c0_4 = arith.constant 0 : index
    %3 = vector.load %arg2[%c0_3, %c0_4] : memref<128x32xbf16, #tpu.memory_space<vmem>>, vector<128x32xbf16>
    %c0_5 = arith.constant 0 : index
    %c0_6 = arith.constant 0 : index
    %4 = vector.load %arg4[%c0_5, %c0_6] : memref<32x32xbf16, #tpu.memory_space<vmem>>, vector<32x32xbf16>
    %cst_7 = arith.constant dense<0.000000e+00> : vector<128x32xf32>
    %5 = tpu.matmul %3, %4, %cst_7 {dimension_numbers = #tpu.dot_dimension_numbers<[1], [0], [0], [1], [0, 0, 1, 1], [], []>} : vector<128x32xbf16>, vector<32x32xbf16>, vector<128x32xf32> -> vector<128x32xf32>
    %6 = arith.addf %2, %5 : vector<128x32xf32>
    %c0_8 = arith.constant 0 : index
    %c0_9 = arith.constant 0 : index
    %7 = vector.load %arg5[%c0_8, %c0_9] : memref<1x32xf32, #tpu.memory_space<vmem>>, vector<1x32xf32>
    %8 = vector.broadcast %7 : vector<1x32xf32> to vector<128x32xf32>
    %9 = arith.addf %6, %8 : vector<128x32xf32>
    %cst_10 = arith.constant 0.000000e+00 : f32
    %10 = vector.broadcast %cst_10 : f32 to vector<128x32xf32>
    %11 = arith.maximumf %9, %10 : vector<128x32xf32>
    %c0_11 = arith.constant 0 : index
    %c0_12 = arith.constant 0 : index
    %12 = vector.load %arg6[%c0_11, %c0_12] : memref<1x32xf32, #tpu.memory_space<vmem>>, vector<1x32xf32>
    %cst_13 = arith.constant dense<0.000000e+00> : vector<1x128xf32>
    %13 = tpu.matmul %12, %11, %cst_13 {dimension_numbers = #tpu.dot_dimension_numbers<[1], [1], [0], [0], [0, 0, 1, 0], [], []>} : vector<1x32xf32>, vector<128x32xf32>, vector<1x128xf32> -> vector<1x128xf32>
    %c0_14 = arith.constant 0 : index
    %c0_15 = arith.constant 0 : index
    %14 = vector.load %arg7[%c0_14, %c0_15] : memref<1x1xf32, #tpu.memory_space<vmem>>, vector<1x1xf32>
    %15 = vector.broadcast %14 : vector<1x1xf32> to vector<1x128xf32>
    %16 = arith.addf %13, %15 : vector<1x128xf32>
    %17 = arith.negf %16 : vector<1x128xf32>
    %18 = math.exp %17 : vector<1x128xf32>
    %cst_16 = arith.constant 1.000000e+00 : f32
    %19 = vector.broadcast %cst_16 : f32 to vector<1x128xf32>
    %20 = arith.addf %19, %18 : vector<1x128xf32>
    %21 = arith.divf %19, %20 : vector<1x128xf32>
    %c0_17 = arith.constant 0 : index
    %c0_18 = arith.constant 0 : index
    %22 = vector.load %arg8[%c0_17, %c0_18] : memref<1x128xf32, #tpu.memory_space<vmem>>, vector<1x128xf32>
    tpu.vector_store %arg8[%c0_17, %c0_18], %21 {strides = array<i32>} : memref<1x128xf32, #tpu.memory_space<vmem>>, vector<1x128xf32>,
    return
  }
  func.func @transform_0(%arg0: i32) -> (i32, i32) {
    %c0_i32 = arith.constant 0 : i32
    %c0_i32_0 = arith.constant 0 : i32
    return %arg0, %c0_i32 : i32, i32
  }
  func.func @transform_1(%arg0: i32) -> (i32, i32) {
    %c0_i32 = arith.constant 0 : i32
    %c0_i32_0 = arith.constant 0 : i32
    return %arg0, %c0_i32 : i32, i32
  }
  func.func @transform_2(%arg0: i32) -> (i32, i32) {
    %c0_i32 = arith.constant 0 : i32
    %c0_i32_0 = arith.constant 0 : i32
    %c0_i32_1 = arith.constant 0 : i32
    return %c0_i32, %c0_i32_0 : i32, i32
  }
  func.func @transform_3(%arg0: i32) -> (i32, i32) {
    %c0_i32 = arith.constant 0 : i32
    %c0_i32_0 = arith.constant 0 : i32
    %c0_i32_1 = arith.constant 0 : i32
    return %c0_i32, %c0_i32_0 : i32, i32
  }
  func.func @transform_4(%arg0: i32) -> (i32, i32) {
    %c0_i32 = arith.constant 0 : i32
    %c0_i32_0 = arith.constant 0 : i32
    %c0_i32_1 = arith.constant 0 : i32
    return %c0_i32, %c0_i32_0 : i32, i32
  }
  func.func @transform_5(%arg0: i32) -> (i32, i32) {
    %c0_i32 = arith.constant 0 : i32
    %c0_i32_0 = arith.constant 0 : i32
    %c0_i32_1 = arith.constant 0 : i32
    return %c0_i32, %c0_i32_0 : i32, i32
  }
  func.func @transform_6(%arg0: i32) -> (i32, i32) {
    %c0_i32 = arith.constant 0 : i32
    %c0_i32_0 = arith.constant 0 : i32
    %c0_i32_1 = arith.constant 0 : i32
    return %c0_i32, %c0_i32_0 : i32, i32
  }
  func.func @transform_7(%arg0: i32) -> (i32, i32) {
    %c0_i32 = arith.constant 0 : i32
    %c0_i32_0 = arith.constant 0 : i32
    return %c0_i32, %arg0 : i32, i32
  }
}

</mosaic_0001>

<bundles_post_ra>
// kernel: tpu_custom_call.1
= control target key start
LH: loop header
LB: loop body
LE: loop exit
PB: predicated region body
PF: predicated region fallthrough
CT: control target
= control target key end

     0   :  { %s1051_s0 = inlined_call_operand.vmem [shape: bf16[128,32], index: 0, kind: input, shape index: {}]   ;;  %s1052_s1 = inlined_call_operand.vmem [shape: bf16[128,32], index: 1, kind: input, shape index: {}]   ;;  %s1053_s2 = inlined_call_operand.vmem [shape: bf16[32,32], index: 2, kind: input, shape index: {}]   ;;  %s1054_s3 = inlined_call_operand.vmem [shape: bf16[32,32], index: 3, kind: input, shape index: {}]   ;;  %s1055_s4 = inlined_call_operand.vmem [shape: f32[1,32], index: 4, kind: input, shape index: {}]   ;;  %s1056_s5 = inlined_call_operand.vmem [shape: f32[1,32], index: 5, kind: input, shape index: {}]   ;;  %s1057_s6 = inlined_call_operand.<no memory space> [shape: f32[1,1], index: 6, kind: input, shape index: {}]   ;;  %s1058_s7 = inlined_call_operand.hbm [shape: f32[1,128], index: 7, kind: output, shape index: {}]  }
   0x1   :  { %v12_v0 = vstv %s1057_s6 }
   0x2   :  { %13 = vst [vmem:[#allocation2] sm:$0x1] %v12_v0 }
   0x3   :  { %v830_v1 = vld [vmem:[%s1054_s3] sm:$0xff]   ;;  %v831_v2 = vld [vmem:[%s1054_s3 + $0x8] sm:$0xff]   ;;  %vm122_vm0 = vcmask 261120   ;;  %v835_v6 = vld [vmem:[%s1052_s1 + $0x10] sm:$0xff]  }
   0x4   :  { %701 = vmatprep.subr.bf16.mxu0 %v830_v1  ;;  %v832_v3 = vld [vmem:[%s1052_s1] sm:$0xff]   ;;  %v833_v5 = vld [vmem:[%s1052_s1 + $0x8] sm:$0xff]   ;;  %v836_v8 = vld [vmem:[%s1052_s1 + $0x18] sm:$0xff]  }
   0x5   :  { %702 = vmatpush3.bf16.msra.mxu0 %v830_v1  ;;  %705 = vmatprep.mubr.msk.bf16.mxu0 %vm122_vm0, %v832_v3  ;;  %v834_v4 = vld [vmem:[%s1053_s2] sm:$0xff]   ;;  %v839_v7 = vld [vmem:[%s1053_s2 + $0x8] sm:$0xff]  }
   0x6   :  { %703 = vmatprep.subr.bf16.mxu0 %v831_v2  ;;  %v837_v9 = vld [vmem:[%s1052_s1 + $0x20] sm:$0xff]  }
   0x9   :  { %704 = vmatpush3.bf16.msra.mxu0 %v831_v2 }
   0xa   :  { %721 = vmatprep.subr.bf16.mxu0 %v834_v4 }
   0xc   :  { %706 = vmatmul.mubr.msk.bf16.vlgmr.msra.gmra.mrb[0].mxu0 %vm122_vm0, %v833_v5 }
   0xd   :  { %722 = vmatpush3.bf16.msra.mxu0 %v834_v4  ;;  %709 = vmatprep.mubr.msk.bf16.mxu0 %vm122_vm0, %v835_v6 }
   0xe   :  { %723 = vmatprep.subr.bf16.mxu0 %v839_v7 }
  0x11   :  { %724 = vmatpush3.bf16.msra.mxu0 %v839_v7 }
  0x14   :  { %710 = vmatmul.mubr.msk.bf16.gmra.mrb[4].mxu0 %vm122_vm0, %v836_v8 }
  0x15   :  { %713 = vmatprep.mubr.msk.bf16.mxu0 %vm122_vm0, %v837_v9 }
  0x16   :  { %14 = vsyncpa [#allocation4], 0  ;;  %v838_v10 = vld [vmem:[%s1052_s1 + $0x28] sm:$0xff]   ;;  %v840_v11 = vld [vmem:[%s1052_s1 + $0x30] sm:$0xff]   ;;  %v878_v21 = vmov 0.0|0.0   ;;  %vm879_vm1 = vmmov 0  }
  0x17   :  { %v841_v12 = vld [vmem:[%s1052_s1 + $0x38] sm:$0xff]   ;;  %v842_v13 = vld [vmem:[%s1051_s0] sm:$0xff]   ;;  %v843_v14 = vld [vmem:[%s1051_s0 + $0x8] sm:$0xff]   ;;  %776 = vmatprep.subr.bf16.mxu1 %v878_v21  ;;  %v880_v22 = vmov 0.0   ;;  %v881_v24 = vmov 0   ;;  %s882_s16 = smov [#allocation3]  }
  0x18   :  { %v844_v15 = vld [vmem:[%s1051_s0 + $0x10] sm:$0xff]   ;;  %v845_v16 = vld [vmem:[%s1051_s0 + $0x18] sm:$0xff]   ;;  %v846_v17 = vld [vmem:[%s1051_s0 + $0x20] sm:$0xff]   ;;  %773 = vmatprep.mubr.msk.f32.mxu1 %vm879_vm1, %v880_v22  ;;  %829 = vset.pattern.permute.xlu0 %v881_v24  ;;  %s601_s17 = sshll.u32 %s882_s16, 4  ;;  %s602_s17 = int_to_ptr.vmem [resolvable:$true] %s601_s17 }
  0x19   :  { %v847_v18 = vld [vmem:[%s1051_s0 + $0x28] sm:$0xff]   ;;  %v848_v19 = vld [vmem:[%s1051_s0 + $0x30] sm:$0xff]   ;;  %v849_v20 = vld [vmem:[%s1051_s0 + $0x38] sm:$0xff]   ;;  %s858_s18 = scalar_lea.vmem %s602_s17, 32  ;;  %p859_p1 = scmp.lt.s32.totalorder %s602_s17, %s602_s17 }
  0x1a   :  { %v457_v23 = vld [vmem:[#allocation2] sm:$0x1]  ;;  %vm1008_vm2 = vmpackc.low %vm122_vm0, %vm122_vm0 }
  0x1b   :  { %460 = vperm.xlu0 %829, %v457_v23   ;;  %v645_v25 = vld [vmem:[%s1055_s4] ss:$0 sm:$0xff] }
  0x1c   :  { %714 = vmatmul.mubr.msk.bf16.gmra.mrb[8].mxu0 %vm122_vm0, %v838_v10 }
  0x1d   :  { %717 = vmatprep.mubr.msk.bf16.mxu0 %vm122_vm0, %v840_v11 }
  0x24   :  { %718 = vmatmul.mubr.msk.bf16.gmra.mrb[12].mxu0 %vm122_vm0, %v841_v12 }
  0x25   :  { %725 = vmatprep.mubr.msk.bf16.mxu0 %vm122_vm0, %v842_v13 }
  0x2c   :  { %726 = vmatmul.mubr.msk.bf16.vlgmr.msra.gmra.mrb[0].mxu0 %vm122_vm0, %v843_v14 }
  0x2d   :  { %729 = vmatprep.mubr.msk.bf16.mxu0 %vm122_vm0, %v844_v15 }
  0x34   :  { %730 = vmatmul.mubr.msk.bf16.gmra.mrb[4].mxu0 %vm122_vm0, %v845_v16 }
  0x35   :  { %733 = vmatprep.mubr.msk.bf16.mxu0 %vm122_vm0, %v846_v17 }
  0x3c   :  { %734 = vmatmul.mubr.msk.bf16.gmra.mrb[8].mxu0 %vm122_vm0, %v847_v18 }
  0x3d   :  { %737 = vmatprep.mubr.msk.bf16.mxu0 %vm122_vm0, %v848_v19  ;;  %v456_v19 = vld [vmem:[%s1056_s5] sm:$0x1]  ;;  %s854_s5 = scalar_lea.vmem %s602_s17, 16 }
  0x3e   :  { %p855_p0 = scmp.ne.s32.totalorder %s602_s17, %s854_s5  ;;  %p860_p2 = scmp.lt.s32.totalorder %s858_s18, %s854_s5 }
  0x40   :  { %p861_p3 = por %p860_p2, %p859_p1 }
  0x42   :  { %p862_p4 = pnand %p861_p3, %p855_p0 }
  0x44   :  { %738 = vmatmul.mubr.msk.bf16.gmra.mrb[12].mxu0 %vm122_vm0, %v849_v20  ;;  %v463_v20 = vlaneseq }
  0x46   :  { %v464_v22 = vshrl.u32 %v463_v20, 7 }
  0x48   :  { %v465_v23 = vsub.s32 0, %v464_v22 }
  0x9a   :  { %v461_v24 = vpop.permute.xlu0 %460 }
  0xff   :  { %v727_v26 = vpop.f32.mrb[0].mxu0 }
 0x100   :  { %v426_v27 = vadd.f32 %v727_v26, %v645_v25  ;;  %v354_v28 = vpop.f32.mrb[1].mxu0 }
 0x101   :  { %v424_v29 = vadd.f32 %v645_v25, %v354_v28  ;;  %v728_v30 = vpop.f32.mrb[2].mxu0 }
 0x102   :  { %v427_v31 = vadd.f32 %v728_v30, %v645_v25  ;;  %v357_v32 = vpop.f32.mrb[3].mxu0  ;;  %v442_v34 = vmax.f32 %v426_v27, 0.0 }
 0x103   :  { %v425_v33 = vadd.f32 %v645_v25, %v357_v32  ;;  %v440_v36 = vmax.f32 %v424_v29, 0.0 }
 0x104   :  { %v443_v35 = vmax.f32 %v427_v31, 0.0 }
 0x105   :  { %v441_v37 = vmax.f32 %v425_v33, 0.0 }
 0x106   :  { %v781_v38 = vpack.c.bf16 %v443_v35, %v442_v34 }
 0x107   :  { %v777_v40 = vpack.c.bf16 %v441_v37, %v440_v36  ;;  %v731_v41 = vpop.f32.mrb[4].mxu0 }
 0x108   :  { %v430_v42 = vadd.f32 %v731_v41, %v645_v25  ;;  %v370_v43 = vpop.f32.mrb[5].mxu0 }
 0x109   :  { %v428_v44 = vadd.f32 %v645_v25, %v370_v43  ;;  %v732_v45 = vpop.f32.mrb[6].mxu0  ;;  %779 = vmatpush3.bf16.xpose.msk.msra.mxu1 %vm1008_vm2, %v777_v40 }
 0x10a   :  { %v431_v46 = vadd.f32 %v732_v45, %v645_v25  ;;  %v373_v47 = vpop.f32.mrb[7].mxu0  ;;  %780 = vmatprep.subr.bf16.mxu1 %v878_v21  ;;  %v446_v49 = vmax.f32 %v430_v42, 0.0 }
 0x10b   :  { %v429_v48 = vadd.f32 %v645_v25, %v373_v47  ;;  %v444_v51 = vmax.f32 %v428_v44, 0.0 }
 0x10c   :  { %v447_v50 = vmax.f32 %v431_v46, 0.0 }
 0x10d   :  { %v445_v52 = vmax.f32 %v429_v48, 0.0 }
 0x10e   :  { %v789_v53 = vpack.c.bf16 %v447_v50, %v446_v49 }
 0x10f   :  { %v785_v54 = vpack.c.bf16 %v445_v52, %v444_v51  ;;  %v735_v55 = vpop.f32.mrb[8].mxu0 }
 0x110   :  { %v434_v56 = vadd.f32 %v735_v55, %v645_v25  ;;  %v386_v57 = vpop.f32.mrb[9].mxu0 }
 0x111   :  { %v432_v58 = vadd.f32 %v645_v25, %v386_v57  ;;  %v736_v59 = vpop.f32.mrb[10].mxu0  ;;  %783 = vmatpush3.bf16.xpose.msk.msra.mxu1 %vm1008_vm2, %v781_v38 }
 0x112   :  { %v435_v60 = vadd.f32 %v736_v59, %v645_v25  ;;  %v389_v61 = vpop.f32.mrb[11].mxu0  ;;  %784 = vmatprep.subr.bf16.mxu1 %v878_v21  ;;  %v450_v63 = vmax.f32 %v434_v56, 0.0 }
 0x113   :  { %v433_v62 = vadd.f32 %v645_v25, %v389_v61  ;;  %v448_v1 = vmax.f32 %v432_v58, 0.0 }
 0x114   :  { %v451_v0 = vmax.f32 %v435_v60, 0.0 }
 0x115   :  { %v449_v2 = vmax.f32 %v433_v62, 0.0 }
 0x116   :  { %v797_v3 = vpack.c.bf16 %v451_v0, %v450_v63 }
 0x117   :  { %v793_v4 = vpack.c.bf16 %v449_v2, %v448_v1  ;;  %v739_v5 = vpop.f32.mrb[12].mxu0 }
 0x118   :  { %v438_v6 = vadd.f32 %v739_v5, %v645_v25  ;;  %v402_v7 = vpop.f32.mrb[13].mxu0 }
 0x119   :  { %v436_v8 = vadd.f32 %v645_v25, %v402_v7  ;;  %v740_v9 = vpop.f32.mrb[14].mxu0  ;;  %787 = vmatpush3.bf16.xpose.msk.msra.mxu1 %vm1008_vm2, %v785_v54 }
 0x11a   :  { %v439_v10 = vadd.f32 %v740_v9, %v645_v25  ;;  %v405_v11 = vpop.f32.mrb[15].mxu0  ;;  %788 = vmatprep.subr.bf16.mxu1 %v878_v21  ;;  %v454_v13 = vmax.f32 %v438_v6, 0.0 }
 0x11b   :  { %v437_v12 = vadd.f32 %v645_v25, %v405_v11  ;;  %v452_v15 = vmax.f32 %v436_v8, 0.0  ;;  %v466_v25 = vrot.slane %v461_v24, %v465_v23 }
 0x11c   :  { %v455_v14 = vmax.f32 %v439_v10, 0.0 }
 0x11d   :  { %v453_v16 = vmax.f32 %v437_v12, 0.0 }
 0x11e   :  { %v805_v17 = vpack.c.bf16 %v455_v14, %v454_v13 }
 0x11f   :  { %v801_v18 = vpack.c.bf16 %v453_v16, %v452_v15 }
 0x121   :  { %791 = vmatpush3.bf16.xpose.msk.msra.mxu1 %vm1008_vm2, %v789_v53 }
 0x122   :  { %792 = vmatprep.subr.bf16.mxu1 %v878_v21 }
 0x129   :  { %795 = vmatpush3.bf16.xpose.msk.msra.mxu1 %vm1008_vm2, %v793_v4 }
 0x12a   :  { %796 = vmatprep.subr.bf16.mxu1 %v878_v21 }
 0x131   :  { %799 = vmatpush3.bf16.xpose.msk.msra.mxu1 %vm1008_vm2, %v797_v3 }
 0x132   :  { %800 = vmatprep.subr.bf16.mxu1 %v878_v21 }
 0x139   :  { %803 = vmatpush3.bf16.xpose.msk.msra.mxu1 %vm1008_vm2, %v801_v18 }
 0x13a   :  { %804 = vmatprep.subr.bf16.mxu1 %v878_v21 }
 0x141   :  { %807 = vmatpush3.bf16.xpose.msk.msra.mxu1 %vm1008_vm2, %v805_v17 }
 0x148   :  { %774 = vmatmul.mubr.msk.f32.vlgmr.msra.gmra.mrb[0].mxu1 %vm122_vm0, %v456_v19 }
 0x21b   :  { %v584_v26 = vpop.f32.mrb[0].mxu1 }
 0x21c   :  { %v585_v27 = vadd.f32 %v584_v26, %v466_v25  ;;  %v775_v28 = vpop.f32.mrb[1].mxu1 }
 0x21e   :  { %v663_v29 = vmul.f32 -1.442695, %v585_v27 }
 0x220   :  { %850 = vpow2.f32 %v663_v29 }
 0x22a   :  { %v851_v21 = vpop.eup %850 }
 0x22b   :  { %v591_v30 = vadd.f32 1.0, %v851_v21 }
 0x22d   :  { %852 = vrcp.f32 %v591_v30 }
 0x237   :  { %v853_v31 = vpop.eup %852 }
 0x238   :  { %594 = vst [vmem:[#allocation3] sm:$0x1] %v853_v31 }
 0x239   :  { %865 = shalt.err (!%p862_p4)
}
 0x23a   :  { %s866_s20 = scalar_lea.hbm %s1058_s7, 16 }
 0x23b   :  { %p867_p5 = scmp.ne.s32.totalorder %s1058_s7, %s866_s20  ;;  %p870_p6 = scmp.lt.u32.totalorder %s866_s20, %s1058_s7 }
 0x23d   :  { %p872_p7 = pnand %p870_p6, %p867_p5 }
 0x23f   :  { %875 = shalt.err (!%p872_p7)
}
 0x240   :  { %604 = dma.vmem_to_hbm [thread:$0]  %s602_s17, 16, %s1058_s7, [#allocation4]  }
 0x241   :  { %876 = dma.done.wait [#allocation4], 16  }
 0x242   :  { %877 = vsyncadd [#allocation4], 4294967280 }
 0x243   :  { %608 = vsyncpa [#allocation4], 1 }

</bundles_post_ra>
